<compile_context>
chip_gen: v7x
topology: tpu7x:2x2x1
jax: 0.10.0
libtpu: 0.0.40
codegen_flags: <defaults>
</compile_context>

<pallas_src>
import functools

import jax
import jax.numpy as jnp
from jax import lax
from jax.experimental import pallas as pl
from jax.experimental.pallas import tpu as pltpu

_VMEM_LIMIT_BYTES = 32 * 1024 * 1024  # safe on v5e/v6e/v7x


def _pool_conv_kernel(hw, tile_hw, ragged, inv_hw,
                      x_ref, w_ref, b_ref, o_ref, acc_ref):
    """Phase 1: streaming global-avg-pool + folded 1x1 conv/BN/ReLU.

    x_ref:   (1, Cin, tile_hw)  native dtype
    w_ref:   (Cout, Cin)        f32, BN scale folded in (resident; constant index_map)
    b_ref:   (Cout, 1)          f32, BN shift folded in
    o_ref:   (1, Cout, 1)       f32 pooled/conv/BN/ReLU result
    acc_ref: (Cin, 128)         f32 running spatial sum (all lanes identical)
    """
    t = pl.program_id(1)

    @pl.when(t == 0)
    def _():
        acc_ref[...] = jnp.zeros_like(acc_ref)

    x = x_ref[0]                                     # (Cin, tile_hw), no upcast
    if ragged:
        # Mask the out-of-range lanes of the last (partial) HW tile.
        lane = lax.broadcasted_iota(jnp.int32, (1, tile_hw), 1)
        valid = (t * tile_hw + lane) < hw
        x = jnp.where(valid, x, jnp.zeros_like(x))

    # Lane reduction on the MXU (x @ ones), f32 accumulation. N=128 keeps the
    # matmul lane-aligned; all 128 result lanes are equal. MXU is idle slack
    # in this memory-bound phase, so the redundancy is free.
    ones = jnp.ones((tile_hw, 128), dtype=x.dtype)
    acc_ref[...] += jnp.dot(x, ones, preferred_element_type=jnp.float32)

    @pl.when(t == pl.num_programs(1) - 1)
    def _():
        pooled = acc_ref[...] * inv_hw                                 # (Cin, 128)
        y = jnp.dot(w_ref[...], pooled,
                    preferred_element_type=jnp.float32)                # (Cout, 128)
        y = jnp.maximum(y + b_ref[...], 0.0)                           # bias + ReLU
        o_ref[...] = y[None, :, :1].astype(o_ref.dtype)                # (1, Cout, 1)


def _broadcast_kernel(y_ref, o_ref):
    """Phase 2: (1, Cout, 1) -> (1, Cout, tile_hw) lane-dense broadcast store."""
    o_ref[...] = jnp.broadcast_to(y_ref[...], o_ref.shape).astype(o_ref.dtype)


def _pick_tile_hw(rows, hw, itemsize, budget_bytes, lane_cap):
    """HW tile: multiple of 128 (or the full extent), sized so rows x tile fits budget."""
    if hw <= 128:
        return int(hw)                       # full spatial extent == full array dim
    fit = (budget_bytes // max(1, rows * itemsize)) // 128 * 128
    fit = max(128, fit)
    return int(min(fit, lane_cap, (hw // 128) * 128))


def aspp_pooling(x, weight, gamma, beta, running_mean, running_var, eps=1e-5):
    """x: (N, Cin, H, W) NCHW; weight: (Cout, Cin, 1, 1). Returns (N, Cout, H, W)."""
    n, cin, h, w = x.shape
    cout = weight.shape[0]
    hw = h * w

    # Fold inference-mode BatchNorm into the 1x1 conv (trace-time, tiny).
    scale = gamma.astype(jnp.float32) * lax.rsqrt(
        running_var.astype(jnp.float32) + eps)                        # (Cout,)
    w_fold = weight.reshape(cout, cin).astype(jnp.float32) * scale[:, None]
    b_fold = (beta.astype(jnp.float32)
              - running_mean.astype(jnp.float32) * scale).reshape(cout, 1)

    x_flat = x.reshape(n, cin, hw)

    # ---- Phase 1: reduction over HW (last grid axis, 'arbitrary'), N parallel.
    tile1 = _pick_tile_hw(cin, hw, x.dtype.itemsize,
                          budget_bytes=4 << 20, lane_cap=2048)
    num_t1 = pl.cdiv(hw, tile1)
    ragged1 = (hw % tile1) != 0

    pool_kernel = functools.partial(_pool_conv_kernel, hw, tile1, ragged1,
                                    1.0 / float(hw))

    pooled = pl.pallas_call(
        pool_kernel,
        out_shape=jax.ShapeDtypeStruct((n, cout, 1), jnp.float32),
        grid_spec=pltpu.PrefetchScalarGridSpec(
            num_scalar_prefetch=0,
            grid=(n, num_t1),
            in_specs=[
                pl.BlockSpec((1, cin, tile1), lambda i, t: (i, 0, t)),
                pl.BlockSpec((cout, cin), lambda i, t: (0, 0)),
                pl.BlockSpec((cout, 1), lambda i, t: (0, 0)),
            ],
            out_specs=pl.BlockSpec((1, cout, 1), lambda i, t: (i, 0, 0)),
            scratch_shapes=[pltpu.VMEM((cin, 128), jnp.float32)],
        ),
        compiler_params=pltpu.CompilerParams(
            dimension_semantics=("parallel", "arbitrary"),
            vmem_limit_bytes=_VMEM_LIMIT_BYTES),
    )(x_flat, w_fold, b_fold)

    # ---- Phase 2: broadcast "upsample" 1x1 -> HxW, fully parallel.
    # Tile sized off Cout (typically << Cin), so bigger lane-dense tiles.
    tile2 = _pick_tile_hw(cout, hw, x.dtype.itemsize,
                          budget_bytes=8 << 20, lane_cap=8192)
    num_t2 = pl.cdiv(hw, tile2)

    out_flat = pl.pallas_call(
        _broadcast_kernel,
        out_shape=jax.ShapeDtypeStruct((n, cout, hw), x.dtype),
        grid_spec=pltpu.PrefetchScalarGridSpec(
            num_scalar_prefetch=0,
            grid=(n, num_t2),
            in_specs=[pl.BlockSpec((1, cout, 1), lambda i, t: (i, 0, 0))],
            out_specs=pl.BlockSpec((1, cout, tile2), lambda i, t: (i, 0, t)),
        ),
        compiler_params=pltpu.CompilerParams(
            dimension_semantics=("parallel", "parallel"),
            vmem_limit_bytes=_VMEM_LIMIT_BYTES),
    )(pooled)

    return out_flat.reshape(n, cout, h, w)


def _reference(x, weight, gamma, beta, running_mean, running_var, eps=1e-5):
    """Pure-JAX reference of the same forward pass (inference-mode BN)."""
    n, cin, h, w = x.shape
    cout = weight.shape[0]
    pooled = jnp.mean(x.astype(jnp.float32), axis=(2, 3))                 # (N, Cin)
    y = pooled @ weight.reshape(cout, cin).astype(jnp.float32).T          # (N, Cout)
    y = (y - running_mean) / jnp.sqrt(running_var + eps) * gamma + beta
    y = jnp.maximum(y, 0.0)
    return jnp.broadcast_to(y[:, :, None, None], (n, cout, h, w)).astype(x.dtype)


def _run_case(key, n, cin, cout, h, w):
    k_x, k_w, k_g, k_b, k_m, k_v = jax.random.split(key, 6)
    x = jax.random.normal(k_x, (n, cin, h, w), dtype=jnp.float32)
    weight = 0.1 * jax.random.normal(k_w, (cout, cin, 1, 1), dtype=jnp.float32)
    gamma = 1.0 + 0.05 * jax.random.normal(k_g, (cout,), dtype=jnp.float32)
    beta = 0.05 * jax.random.normal(k_b, (cout,), dtype=jnp.float32)
    running_mean = 0.1 * jax.random.normal(k_m, (cout,), dtype=jnp.float32)
    running_var = jnp.abs(
        1.0 + 0.1 * jax.random.normal(k_v, (cout,), dtype=jnp.float32))

    out = aspp_pooling(x, weight, gamma, beta, running_mean, running_var)
    out = jax.block_until_ready(out)
    ref = _reference(x, weight, gamma, beta, running_mean, running_var)

    assert out.shape == (n, cout, h, w), out.shape
    err = float(jnp.max(jnp.abs(out - ref)))
    assert jnp.allclose(out, ref, atol=1e-5, rtol=1e-5), err


if __name__ == "__main__":
    key = jax.random.PRNGKey(0)
    k1, k2 = jax.random.split(key, 2)

    # Primary small case (matches the module's typical usage, tiny shapes).
    _run_case(k1, n=2, cin=4, cout=8, h=16, w=16)
    # Ragged-HW case (HW not a multiple of the 128-lane tile) to exercise masking.
    _run_case(k2, n=2, cin=4, cout=8, h=20, w=20)

    print("KERNEL_OK")
</pallas_src>

<mosaic_0001>
module attributes {stable_mosaic.version = 11 : i64} {
  func.func @_pool_conv_kernel(%arg0: i32, %arg1: i32, %arg2: memref<1x4x256xf32, #tpu.memory_space<vmem>>, %arg3: memref<8x4xf32, #tpu.memory_space<vmem>>, %arg4: memref<8x1xf32, #tpu.memory_space<vmem>>, %arg5: memref<1x8x1xf32, #tpu.memory_space<vmem>>, %arg6: memref<4x128xf32, #tpu.memory_space<vmem>>) attributes {dimension_semantics = [#tpu.dimension_semantics<parallel>, #tpu.dimension_semantics<arbitrary>], iteration_bounds = array<i64: 2, 1>, scalar_prefetch = 0 : i64, scratch_operands = 1 : i64, tpu.core_type = #tpu.core_type<tc>, window_params = [{transform_indices = @transform_0, window_bounds = array<i64: 1, 4, 256>}, {pipeline_mode = #tpu.pipeline_mode<synchronous>, transform_indices = @transform_1, window_bounds = array<i64: 8, 4>}, {pipeline_mode = #tpu.pipeline_mode<synchronous>, transform_indices = @transform_2, window_bounds = array<i64: 8, 1>}, {transform_indices = @transform_3, window_bounds = array<i64: 1, 8, 1>}]} {
    %c0_i32 = arith.constant 0 : i32
    %0 = arith.cmpi eq, %arg1, %c0_i32 : i32
    %1 = arith.extui %0 : i1 to i32
    %c0_i32_0 = arith.constant 0 : i32
    %2 = arith.cmpi ne, %1, %c0_i32_0 : i32
    scf.if %2 {
      %cst_10 = arith.constant 0.000000e+00 : f32
      %13 = vector.broadcast %cst_10 : f32 to vector<4x128xf32>
      %c0_11 = arith.constant 0 : index
      %c0_12 = arith.constant 0 : index
      %14 = vector.load %arg6[%c0_11, %c0_12] : memref<4x128xf32, #tpu.memory_space<vmem>>, vector<4x128xf32>
      tpu.vector_store %arg6[%c0_11, %c0_12], %13 {strides = array<i32>} : memref<4x128xf32, #tpu.memory_space<vmem>>, vector<4x128xf32>,
    } else {
    }
    %c0 = arith.constant 0 : index
    %c0_1 = arith.constant 0 : index
    %c0_2 = arith.constant 0 : index
    %3 = vector.load %arg2[%c0, %c0_1, %c0_2] : memref<1x4x256xf32, #tpu.memory_space<vmem>>, vector<1x4x256xf32>
    %4 = vector.shape_cast %3 : vector<1x4x256xf32> to vector<4x256xf32>
    %cst = arith.constant 1.000000e+00 : f32
    %5 = vector.broadcast %cst : f32 to vector<256x128xf32>
    %c0_3 = arith.constant 0 : index
    %c0_4 = arith.constant 0 : index
    %6 = vector.load %arg6[%c0_3, %c0_4] : memref<4x128xf32, #tpu.memory_space<vmem>>, vector<4x128xf32>
    %cst_5 = arith.constant dense<0.000000e+00> : vector<4x128xf32>
    %7 = tpu.matmul %4, %5, %cst_5 {dimension_numbers = #tpu.dot_dimension_numbers<[1], [0], [0], [1], [0, 0, 1, 1], [], []>} : vector<4x256xf32>, vector<256x128xf32>, vector<4x128xf32> -> vector<4x128xf32>
    %8 = arith.addf %6, %7 : vector<4x128xf32>
    %c0_6 = arith.constant 0 : index
    %c0_7 = arith.constant 0 : index
    %9 = vector.load %arg6[%c0_6, %c0_7] : memref<4x128xf32, #tpu.memory_space<vmem>>, vector<4x128xf32>
    tpu.vector_store %arg6[%c0_6, %c0_7], %8 {strides = array<i32>} : memref<4x128xf32, #tpu.memory_space<vmem>>, vector<4x128xf32>,
    %c0_i32_8 = arith.constant 0 : i32
    %10 = arith.cmpi eq, %arg1, %c0_i32_8 : i32
    %11 = arith.extui %10 : i1 to i32
    %c0_i32_9 = arith.constant 0 : i32
    %12 = arith.cmpi ne, %11, %c0_i32_9 : i32
    scf.if %12 {
      %c0_10 = arith.constant 0 : index
      %c0_11 = arith.constant 0 : index
      %13 = vector.load %arg6[%c0_10, %c0_11] : memref<4x128xf32, #tpu.memory_space<vmem>>, vector<4x128xf32>
      %cst_12 = arith.constant 3.906250e-03 : f32
      %14 = vector.broadcast %cst_12 : f32 to vector<4x128xf32>
      %15 = arith.mulf %13, %14 : vector<4x128xf32>
      %c0_13 = arith.constant 0 : index
      %c0_14 = arith.constant 0 : index
      %16 = vector.load %arg3[%c0_13, %c0_14] : memref<8x4xf32, #tpu.memory_space<vmem>>, vector<8x4xf32>
      %cst_15 = arith.constant dense<0.000000e+00> : vector<8x128xf32>
      %17 = tpu.matmul %16, %15, %cst_15 {dimension_numbers = #tpu.dot_dimension_numbers<[1], [0], [0], [1], [0, 0, 1, 1], [], []>} : vector<8x4xf32>, vector<4x128xf32>, vector<8x128xf32> -> vector<8x128xf32>
      %c0_16 = arith.constant 0 : index
      %c0_17 = arith.constant 0 : index
      %18 = vector.load %arg4[%c0_16, %c0_17] : memref<8x1xf32, #tpu.memory_space<vmem>>, vector<8x1xf32>
      %19 = vector.broadcast %18 : vector<8x1xf32> to vector<8x128xf32>
      %20 = arith.addf %17, %19 : vector<8x128xf32>
      %cst_18 = arith.constant 0.000000e+00 : f32
      %21 = vector.broadcast %cst_18 : f32 to vector<8x128xf32>
      %22 = arith.maximumf %20, %21 : vector<8x128xf32>
      %23 = vector.extract_strided_slice %22 {offsets = [0, 0], sizes = [8, 1], strides = [1, 1]} : vector<8x128xf32> to vector<8x1xf32>
      %24 = vector.shape_cast %23 : vector<8x1xf32> to vector<1x8x1xf32>
      %c0_19 = arith.constant 0 : index
      %c0_20 = arith.constant 0 : index
      %c0_21 = arith.constant 0 : index
      %25 = vector.load %arg5[%c0_19, %c0_20, %c0_21] : memref<1x8x1xf32, #tpu.memory_space<vmem>>, vector<1x8x1xf32>
      tpu.vector_store %arg5[%c0_19, %c0_20, %c0_21], %24 {strides = array<i32>} : memref<1x8x1xf32, #tpu.memory_space<vmem>>, vector<1x8x1xf32>,
    } else {
    }
    return
  }
  func.func @transform_0(%arg0: i32, %arg1: i32) -> (i32, i32, i32) {
    %c0_i32 = arith.constant 0 : i32
    %c0_i32_0 = arith.constant 0 : i32
    return %arg0, %c0_i32, %arg1 : i32, i32, i32
  }
  func.func @transform_1(%arg0: i32, %arg1: i32) -> (i32, i32) {
    %c0_i32 = arith.constant 0 : i32
    %c0_i32_0 = arith.constant 0 : i32
    %c0_i32_1 = arith.constant 0 : i32
    return %c0_i32, %c0_i32_0 : i32, i32
  }
  func.func @transform_2(%arg0: i32, %arg1: i32) -> (i32, i32) {
    %c0_i32 = arith.constant 0 : i32
    %c0_i32_0 = arith.constant 0 : i32
    %c0_i32_1 = arith.constant 0 : i32
    return %c0_i32, %c0_i32_0 : i32, i32
  }
  func.func @transform_3(%arg0: i32, %arg1: i32) -> (i32, i32, i32) {
    %c0_i32 = arith.constant 0 : i32
    %c0_i32_0 = arith.constant 0 : i32
    %c0_i32_1 = arith.constant 0 : i32
    return %arg0, %c0_i32, %c0_i32_0 : i32, i32, i32
  }
}

</mosaic_0001>

<bundles_post_ra>
// kernel: tpu_custom_call.1
= control target key start
LH: loop header
LB: loop body
LE: loop exit
PB: predicated region body
PF: predicated region fallthrough
CT: control target
= control target key end

     0   :  { %s588_s12 = smov 0   ;;  %s590_s13 = smov 0   ;;  %s634_s0 = inlined_call_operand.vmem [shape: f32[2,4,256], index: 0, kind: input, shape index: {}]   ;;  %s635_s1 = inlined_call_operand.vmem [shape: f32[8,4], index: 1, kind: input, shape index: {}]   ;;  %s636_s2 = inlined_call_operand.vmem [shape: f32[8,1], index: 2, kind: input, shape index: {}]   ;;  %s637_s3 = inlined_call_operand.vmem [shape: f32[2,8,1], index: 3, kind: output, shape index: {}]  }
   0x1   :  { %s592_s14 = smov 0  }
   0x2 LB: > { %s25_s15 = sadd.s32 1, %s558_s13  ;;  %p443_p0 = scmp.ge.s32.totalorder %s562_s14, 1  ;;  %s562_s14 = sphi %s592_s14, %s13_s14   ;;  %s558_s13 = sphi %s590_s13, %s639_s13   ;;  %s554_s12 = sphi %s588_s12, %s638_s12  }
   0x3   : > { %p27_p1 = scmp.ge.s32.totalorder %s25_s15, 2  ;;  %p156_p2 = scmp.lt.s32.totalorder %s562_s14, 3 }
   0x5   : > { %s641_s15 = smov (%p27_p1, %s25_s15), 0  ;;  %p157_p3 = pnand %p443_p0, %p156_p2 }
   0x6   : > { %p184_p4 = scmp.lt.s32.totalorder (!%p157_p3), %s554_s12, 1  ;;  %v564_v0 = vmov (!%p157_p3), 1.0|1.0   ;;  %v565_v3 = vmov (!%p157_p3), 0.0   ;;  %vm566_vm0 = vmmov (!%p157_p3), 0   ;;  %v285_v4 = vld [vmem:[%s636_s2] sm:$0xff] (!%p157_p3) }
   0x7   : > { %160 = sbr.rel (%p157_p3) target bundleno = 484 (0x1e4), region = 32  ;;  %494 = vmatprep.subr.bf16.mxu0 (!%p157_p3), %v564_v0  ;;  %201 = vst [vmem:[#allocation2] sm:$0xf] (!%p157_p3), %v565_v3  ;;  %489 = vmatprep.subr.mxu1 (!%p157_p3), %v565_v3  ;;  %v567_v5 = vmov (!%p157_p3), 0   ;;  %vm295_vm1 = vcmask (!%p157_p3), 1043456   ;;  %v284_v13 = vld [vmem:[%s635_s1] sm:$0xff] (!%p157_p3) }
   0x8   : > { %495 = vmatpush3.bf16.msra.mxu0 (!%p157_p3), %v564_v0  ;;  %491 = vmatprep.mubr.msk.f32.mxu1 (!%p157_p3), %vm566_vm0, %v565_v3  ;;  %vm291_vm2 = vcmask (!%p157_p3), 31744   ;;  %vm370_vm3 = vcmask (!%p157_p3), 7168  }
   0x9   : > { %496 = vmatprep.subr.bf16.mxu0 (!%p157_p3), %v564_v0  ;;  %538 = vset.pattern.permute.xlu0 (!%p157_p3), %v567_v5 }
   0xa   : > { %288 = vperm.xlu0 (!%p157_p3), %538, %v285_v4  }
   0xc   : > { %497 = vmatpush3.bf16.msra.mxu0 (!%p157_p3), %v564_v0 }
   0xd   : > { %498 = vmatprep.subr.bf16.mxu0 (!%p157_p3), %v564_v0 }
   0xe   : > { %s643_s12 = smov (!%p184_p4, %s554_s12), 1  ;;  %v203_v8 = vld [vmem:[#allocation2] sm:$0xf] }
   0xf   : > { %s451_s16 = sshll.u32 %s643_s12, 3 }
  0x10   : > { %s191_s19 = scalar_lea.vmem %s634_s0, %s451_s16  ;;  %499 = vmatpush3.bf16.msra.mxu0 %v564_v0  ;;  %s196_s26 = scalar_lea.vmem %s637_s3, %s451_s16 }
  0x11   : > { %v202_v1 = vld [vmem:[%s191_s19] sm:$0xff]  ;;  %500 = vmatprep.subr.bf16.mxu0 %v564_v0 }
  0x12   : > { %v205_v2 = vcombine.high %v202_v1, %v202_v1 }
  0x14   : > { %271 = vmatprep.mubr.f32.mxu0 %v205_v2  ;;  %501 = vmatpush3.bf16.msra.mxu0 %v564_v0 }
  0x15   : > { %502 = vmatprep.subr.bf16.mxu0 %v564_v0 }
  0x18   : > { %503 = vmatpush3.bf16.msra.mxu0 %v564_v0 }
  0x19   : > { %504 = vmatprep.subr.bf16.mxu0 %v564_v0 }
  0x1c   : > { %505 = vmatpush3.bf16.msra.mxu0 %v564_v0 }
  0x1d   : > { %506 = vmatprep.subr.bf16.mxu0 %v564_v0 }
  0x20   : > { %507 = vmatpush3.bf16.msra.mxu0 %v564_v0 }
  0x21   : > { %508 = vmatprep.subr.bf16.mxu0 %v564_v0 }
  0x24   : > { %509 = vmatpush3.bf16.msra.mxu0 %v564_v0 }
  0x27   : > { %272 = vmatmul.mubr.f32.vlgmr.msra.gmra.mrb[0].mxu0 %v202_v1 }
  0x89   : > { %v289_v14 = vpop.permute.xlu0 %288 }
  0xfa   : > { %v484_v6 = vpop.f32.mrb[0].mxu0 }
  0xfb   : > { %v485_v7 = vpop.f32.mrb[1].mxu0 }
  0xfc   : > { %v486_v9 = vadd.f32 %v485_v7, %v484_v6 }
  0xfe   : > { %v277_v10 = vadd.f32 %v486_v9, %v203_v8 }
 0x100   : > { %278 = vst [vmem:[#allocation2] sm:$0xf] %v277_v10 }
 0x107   : > { %v282_v11 = vld [vmem:[#allocation2] sm:$0xf] }
 0x108   : > { %v283_v12 = vmul.f32 0.00390625, %v282_v11 }
 0x10a   : > { %490 = vmatpush3.msk.msra.mxu1 %vm295_vm1, %v283_v12 }
 0x10b   : > { %492 = vmatmul.mubr.msk.f32.vlgmr.msra.gmra.mrb[0].mxu1 %vm291_vm2, %v284_v13 }
 0x1de   : > { %v365_v15 = vpop.f32.mrb[0].mxu1 }
 0x1df   : > { %v366_v16 = vadd.f32 %v365_v15, %v289_v14  ;;  %v493_v17 = vpop.f32.mrb[1].mxu1 }
 0x1e1   : > { %v369_v18 = vmax.f32 %v366_v16, 0.0 }
 0x1e3   : > { %371 = vst.msk [vmem:[%s196_s26] sm:$0xff] %vm370_vm3, %v369_v18 }
 0x1e4 PF: > { %s13_s14 = sadd.s32 1, %s562_s14   ;;  %s638_s12 = smov %s558_s13 }
 0x1e5   : > { %p10_p5 = scmp.ge.s32.totalorder %s13_s14, 4   ;;  %s639_s13 = smov %s641_s15 }
 0x1e7   :  { %12 = sbr.rel (!%p10_p5) target bundleno = 2 (0x2), region = 70 }

</bundles_post_ra>
